<compile_context>
chip_gen: v5e
topology: v5e:2x2
jax: 0.10.0
libtpu: 0.0.40
codegen_flags: <defaults>
</compile_context>

<pallas_src>
import functools

import jax
import jax.numpy as jnp
from jax.experimental import pallas as pl
from jax.experimental.pallas import tpu as pltpu

# Model hyperparameters (ATTENTION_HEADS * HEAD_DIM == EMBEDDING_DIM).
EMBEDDING_DIM = 32
ATTENTION_HEADS = 4
HEAD_DIM = EMBEDDING_DIM // ATTENTION_HEADS  # 8
SEQ = 8
BATCH = 2
HIDDEN = 4 * EMBEDDING_DIM
LN_EPS = 1e-5  # TODO(synk): NormalizationLayer source not given; standard LayerNorm(eps=1e-5) assumed.


def _layernorm(x, gamma, beta):
    # x: (N, D); gamma/beta: (1, D); all f32 (VPU math stays f32)
    mean = jnp.mean(x, axis=-1, keepdims=True)
    var = jnp.mean((x - mean) ** 2, axis=-1, keepdims=True)
    return (x - mean) * jax.lax.rsqrt(var + LN_EPS) * gamma + beta


def _gelu_exact(x):
    # nn.GELU() default = exact erf formulation
    return 0.5 * x * (1.0 + jax.lax.erf(x * (1.0 / jnp.sqrt(2.0).astype(x.dtype))))


def decoder_block_kernel(x_ref, wqkv_ref, wo_ref, w1_ref, w2_ref, ln_ref, out_ref, *, B, T):
    D = EMBEDDING_DIM
    hd = HEAD_DIM

    x = x_ref[...]                        # (B*T, D) f32 flattened activations
    g1 = ln_ref[0:1, :]
    b1 = ln_ref[1:2, :]
    g2 = ln_ref[2:3, :]
    b2 = ln_ref[3:4, :]

    # ---- attention branch (pre-LN) ----
    xn = _layernorm(x, g1, b1)                                            # (B*T, D) f32

    # One fused QKV matmul on the MXU: bf16 operands, f32 accumulate.
    qkv = jnp.dot(xn.astype(jnp.bfloat16), wqkv_ref[...],
                  preferred_element_type=jnp.float32)                     # (B*T, 3D) f32

    # Reshape once (leading-dim split: no relayout) and cast to bf16 once;
    # the head loop below only takes static lane slices of this tensor.
    qkv_bf = qkv.reshape(B, T, 3 * D).astype(jnp.bfloat16)                # (B, T, 3D) bf16

    row = jax.lax.broadcasted_iota(jnp.int32, (1, T, T), 1)
    col = jax.lax.broadcasted_iota(jnp.int32, (1, T, T), 2)
    causal_mask = col > row               # (1, T, T); broadcasts over batch

    scale = jnp.float32(1.0 / (hd ** 0.5))

    o_heads = []
    for h in range(ATTENTION_HEADS):      # static unroll; all slices are static
        q = qkv_bf[:, :, h * hd:(h + 1) * hd]                             # (B, T, hd) bf16
        k = qkv_bf[:, :, D + h * hd:D + (h + 1) * hd]
        v = qkv_bf[:, :, 2 * D + h * hd:2 * D + (h + 1) * hd]

        # batched Q @ K^T without materializing a transpose (contract last axes)
        s = jnp.einsum('btd,bsd->bts', q, k,
                       preferred_element_type=jnp.float32) * scale        # (B, T, T) f32
        # -1e30 is safe in f32; the causal diagonal is never masked so the
        # max-subtraction keeps exp finite.
        s = jnp.where(causal_mask, jnp.float32(-1e30), s)
        s = s - jnp.max(s, axis=-1, keepdims=True)
        p = jnp.exp(s)
        p = p * pl.reciprocal(jnp.sum(p, axis=-1, keepdims=True), approx=True)

        o_heads.append(jnp.einsum('bts,bsd->btd', p.astype(jnp.bfloat16), v,
                                  preferred_element_type=jnp.float32))    # (B, T, hd) f32

    # Head concat is a lane-axis stitch inside one vreg width at D=32; the output
    # projection is then a SINGLE MXU dot with K=D (instead of 4 dots with K=hd).
    o_cat = jnp.concatenate(o_heads, axis=-1).reshape(B * T, D)           # (B*T, D) f32
    attn = jnp.dot(o_cat.astype(jnp.bfloat16), wo_ref[...],
                   preferred_element_type=jnp.float32)                    # (B*T, D) f32

    x1 = x + attn                                                          # residual 1

    # ---- MLP branch (pre-LN) ----
    xn2 = _layernorm(x1, g2, b2)                                           # (B*T, D) f32
    h1 = _gelu_exact(jnp.dot(xn2.astype(jnp.bfloat16), w1_ref[...],
                             preferred_element_type=jnp.float32))          # (B*T, 4D) f32
    h2 = jnp.dot(h1.astype(jnp.bfloat16), w2_ref[...],
                 preferred_element_type=jnp.float32)                       # (B*T, D) f32

    out_ref[...] = (x1 + h2).astype(out_ref.dtype)                         # residual 2


def decoder_block(x, params):
    B, T, D = x.shape
    wq, wk, wv, wo, w1, w2, g1, b1, g2, b2 = params

    # Fuse per-head Q/K/V weights into one (D, 3D) matrix wrapper-side
    # (column blocks ordered: [Q head0..H | K head0..H | V head0..H]), and cast
    # all matmul weights to bf16 (MXU-native operand dtype; halves weight DMA).
    wq_full = jnp.transpose(wq, (1, 0, 2)).reshape(D, ATTENTION_HEADS * HEAD_DIM)
    wk_full = jnp.transpose(wk, (1, 0, 2)).reshape(D, ATTENTION_HEADS * HEAD_DIM)
    wv_full = jnp.transpose(wv, (1, 0, 2)).reshape(D, ATTENTION_HEADS * HEAD_DIM)
    wqkv = jnp.concatenate([wq_full, wk_full, wv_full], axis=1).astype(jnp.bfloat16)
    wo_bf = wo.astype(jnp.bfloat16)
    w1_bf = w1.astype(jnp.bfloat16)
    w2_bf = w2.astype(jnp.bfloat16)

    # LayerNorm params stay f32 (VPU math in f32); packed into one (4, D) DMA.
    ln_pack = jnp.concatenate([g1, b1, g2, b2], axis=0)                    # (4, D)

    x_flat = x.reshape(B * T, D)
    # Output stays (B*T, D) (32 active lanes); at D=32 a lane-dense reshuffle would
    # cost more XLU relayout than the single masked store it removes.

    full2d = lambda i: (0, 0)

    out_flat = pl.pallas_call(
        functools.partial(decoder_block_kernel, B=B, T=T),
        out_shape=jax.ShapeDtypeStruct((B * T, D), x.dtype),
        grid_spec=pltpu.PrefetchScalarGridSpec(
            num_scalar_prefetch=0,
            grid=(1,),                       # whole block in one invocation (overhead-bound size)
            in_specs=[
                pl.BlockSpec((B * T, D), full2d),        # x (flattened, f32)
                pl.BlockSpec((D, 3 * D), full2d),        # fused Wqkv (bf16)
                pl.BlockSpec((D, D), full2d),            # attn out proj (bf16)
                pl.BlockSpec((D, HIDDEN), full2d),       # MLP fc_1 (bf16)
                pl.BlockSpec((HIDDEN, D), full2d),       # MLP proj (bf16)
                pl.BlockSpec((4, D), full2d),            # packed LN params (g1,b1,g2,b2)
            ],
            out_specs=pl.BlockSpec((B * T, D), full2d),
        ),
        compiler_params=pltpu.CompilerParams(
            dimension_semantics=("arbitrary",)),
    )(x_flat, wqkv, wo_bf, w1_bf, w2_bf, ln_pack)

    return out_flat.reshape(B, T, D)


# ---------- pure-JAX reference (for correctness check, full f32) ----------
def decoder_block_ref(x, params):
    wq, wk, wv, wo, w1, w2, g1, b1, g2, b2 = params

    def ln(x, g, b):
        m = jnp.mean(x, axis=-1, keepdims=True)
        v = jnp.mean((x - m) ** 2, axis=-1, keepdims=True)
        return (x - m) / jnp.sqrt(v + LN_EPS) * g + b

    xn = ln(x, g1, b1)
    heads = []
    for h in range(ATTENTION_HEADS):
        q = xn @ wq[h]
        k = xn @ wk[h]
        v = xn @ wv[h]
        s = (q @ jnp.swapaxes(k, -2, -1)) / jnp.sqrt(jnp.float32(HEAD_DIM))
        mask = jnp.triu(jnp.ones((s.shape[-2], s.shape[-1]), bool), k=1)
        s = jnp.where(mask, -jnp.inf, s)
        p = jax.nn.softmax(s, axis=-1)
        heads.append(p @ v)
    attn = jnp.concatenate(heads, axis=-1) @ wo
    x = x + attn
    xn2 = ln(x, g2, b2)
    h1 = jax.nn.gelu(xn2 @ w1, approximate=False)
    return x + h1 @ w2


def init_params(key):
    ks = jax.random.split(key, 6)
    std = 0.02
    wq = std * jax.random.normal(ks[0], (ATTENTION_HEADS, EMBEDDING_DIM, HEAD_DIM), jnp.float32)
    wk = std * jax.random.normal(ks[1], (ATTENTION_HEADS, EMBEDDING_DIM, HEAD_DIM), jnp.float32)
    wv = std * jax.random.normal(ks[2], (ATTENTION_HEADS, EMBEDDING_DIM, HEAD_DIM), jnp.float32)
    wo = std * jax.random.normal(ks[3], (EMBEDDING_DIM, EMBEDDING_DIM), jnp.float32)
    w1 = std * jax.random.normal(ks[4], (EMBEDDING_DIM, HIDDEN), jnp.float32)
    w2 = std * jax.random.normal(ks[5], (HIDDEN, EMBEDDING_DIM), jnp.float32)
    g1 = jnp.ones((1, EMBEDDING_DIM), jnp.float32)
    b1 = jnp.zeros((1, EMBEDDING_DIM), jnp.float32)
    g2 = jnp.ones((1, EMBEDDING_DIM), jnp.float32)
    b2 = jnp.zeros((1, EMBEDDING_DIM), jnp.float32)
    return (wq, wk, wv, wo, w1, w2, g1, b1, g2, b2)


if __name__ == "__main__":
    key = jax.random.PRNGKey(0)
    kx, kp = jax.random.split(key)
    x = jax.random.normal(kx, (BATCH, SEQ, EMBEDDING_DIM), jnp.float32)
    params = init_params(kp)

    out = decoder_block(x, params)
    out = jax.block_until_ready(out)

    ref = decoder_block_ref(x, params)
    assert out.shape == (BATCH, SEQ, EMBEDDING_DIM)
    err = jnp.max(jnp.abs(out - ref))
    # tolerance loosened for bf16 MXU operands + approx (EUP) softmax reciprocal
    assert jnp.allclose(out, ref, atol=1e-2, rtol=1e-2), f"max abs err = {err}"
    print("KERNEL_OK")
</pallas_src>

<mosaic_0001>
module attributes {stable_mosaic.version = 11 : i64} {
  func.func @decoder_block_kernel(%arg0: i32, %arg1: memref<16x32xf32, #tpu.memory_space<vmem>>, %arg2: memref<32x96xbf16, #tpu.memory_space<vmem>>, %arg3: memref<32x32xbf16, #tpu.memory_space<vmem>>, %arg4: memref<32x128xbf16, #tpu.memory_space<vmem>>, %arg5: memref<128x32xbf16, #tpu.memory_space<vmem>>, %arg6: memref<4x32xf32, #tpu.memory_space<vmem>>, %arg7: memref<16x32xf32, #tpu.memory_space<vmem>>) attributes {dimension_semantics = [#tpu.dimension_semantics<arbitrary>], iteration_bounds = array<i64: 1>, scalar_prefetch = 0 : i64, scratch_operands = 0 : i64, tpu.core_type = #tpu.core_type<tc>, window_params = [{pipeline_mode = #tpu.pipeline_mode<synchronous>, transform_indices = @transform_0, window_bounds = array<i64: 16, 32>}, {pipeline_mode = #tpu.pipeline_mode<synchronous>, transform_indices = @transform_1, window_bounds = array<i64: 32, 96>}, {pipeline_mode = #tpu.pipeline_mode<synchronous>, transform_indices = @transform_2, window_bounds = array<i64: 32, 32>}, {pipeline_mode = #tpu.pipeline_mode<synchronous>, transform_indices = @transform_3, window_bounds = array<i64: 32, 128>}, {pipeline_mode = #tpu.pipeline_mode<synchronous>, transform_indices = @transform_4, window_bounds = array<i64: 128, 32>}, {pipeline_mode = #tpu.pipeline_mode<synchronous>, transform_indices = @transform_5, window_bounds = array<i64: 4, 32>}, {pipeline_mode = #tpu.pipeline_mode<synchronous>, transform_indices = @transform_6, window_bounds = array<i64: 16, 32>}]} {
    %c0 = arith.constant 0 : index
    %c0_0 = arith.constant 0 : index
    %0 = vector.load %arg1[%c0, %c0_0] : memref<16x32xf32, #tpu.memory_space<vmem>>, vector<16x32xf32>
    %c0_1 = arith.constant 0 : index
    %c0_2 = arith.constant 0 : index
    %1 = vector.load %arg6[%c0_1, %c0_2] : memref<4x32xf32, #tpu.memory_space<vmem>>, vector<1x32xf32>
    %c1 = arith.constant 1 : index
    %c0_3 = arith.constant 0 : index
    %2 = vector.load %arg6[%c1, %c0_3] : memref<4x32xf32, #tpu.memory_space<vmem>>, vector<1x32xf32>
    %c2 = arith.constant 2 : index
    %c0_4 = arith.constant 0 : index
    %3 = vector.load %arg6[%c2, %c0_4] : memref<4x32xf32, #tpu.memory_space<vmem>>, vector<1x32xf32>
    %c3 = arith.constant 3 : index
    %c0_5 = arith.constant 0 : index
    %4 = vector.load %arg6[%c3, %c0_5] : memref<4x32xf32, #tpu.memory_space<vmem>>, vector<1x32xf32>
    %cst = arith.constant dense<0.000000e+00> : vector<16xf32>
    %5 = vector.multi_reduction <add>, %0, %cst [1] : vector<16x32xf32> to vector<16xf32>
    %6 = vector.shape_cast %5 : vector<16xf32> to vector<16x1xf32>
    %cst_6 = arith.constant 3.200000e+01 : f32
    %7 = vector.broadcast %cst_6 : f32 to vector<16x1xf32>
    %8 = arith.divf %6, %7 : vector<16x1xf32>
    %9 = vector.broadcast %8 : vector<16x1xf32> to vector<16x32xf32>
    %10 = arith.subf %0, %9 : vector<16x32xf32>
    %11 = arith.mulf %10, %10 : vector<16x32xf32>
    %cst_7 = arith.constant dense<0.000000e+00> : vector<16xf32>
    %12 = vector.multi_reduction <add>, %11, %cst_7 [1] : vector<16x32xf32> to vector<16xf32>
    %13 = vector.shape_cast %12 : vector<16xf32> to vector<16x1xf32>
    %cst_8 = arith.constant 3.200000e+01 : f32
    %14 = vector.broadcast %cst_8 : f32 to vector<16x1xf32>
    %15 = arith.divf %13, %14 : vector<16x1xf32>
    %16 = vector.broadcast %8 : vector<16x1xf32> to vector<16x32xf32>
    %17 = arith.subf %0, %16 : vector<16x32xf32>
    %cst_9 = arith.constant 9.99999974E-6 : f32
    %18 = vector.broadcast %cst_9 : f32 to vector<16x1xf32>
    %19 = arith.addf %15, %18 : vector<16x1xf32>
    %20 = math.rsqrt %19 : vector<16x1xf32>
    %21 = vector.broadcast %20 : vector<16x1xf32> to vector<16x32xf32>
    %22 = arith.mulf %17, %21 : vector<16x32xf32>
    %23 = vector.broadcast %1 : vector<1x32xf32> to vector<16x32xf32>
    %24 = arith.mulf %22, %23 : vector<16x32xf32>
    %25 = vector.broadcast %2 : vector<1x32xf32> to vector<16x32xf32>
    %26 = arith.addf %24, %25 : vector<16x32xf32>
    %27 = arith.truncf %26 : vector<16x32xf32> to vector<16x32xbf16>
    %c0_10 = arith.constant 0 : index
    %c0_11 = arith.constant 0 : index
    %28 = vector.load %arg2[%c0_10, %c0_11] : memref<32x96xbf16, #tpu.memory_space<vmem>>, vector<32x96xbf16>
    %cst_12 = arith.constant dense<0.000000e+00> : vector<16x96xf32>
    %29 = tpu.matmul %27, %28, %cst_12 {dimension_numbers = #tpu.dot_dimension_numbers<[1], [0], [0], [1], [0, 0, 1, 1], [], []>} : vector<16x32xbf16>, vector<32x96xbf16>, vector<16x96xf32> -> vector<16x96xf32>
    %30 = vector.shape_cast %29 : vector<16x96xf32> to vector<2x8x96xf32>
    %31 = arith.truncf %30 : vector<2x8x96xf32> to vector<2x8x96xbf16>
    %32 = tpu.iota {dimensions = array<i32: 1>} : vector<1x8x8xi32>
    %33 = tpu.iota {dimensions = array<i32: 2>} : vector<1x8x8xi32>
    %34 = arith.cmpi sgt, %33, %32 : vector<1x8x8xi32>
    %35 = vector.extract_strided_slice %31 {offsets = [0, 0, 0], sizes = [2, 8, 8], strides = [1, 1, 1]} : vector<2x8x96xbf16> to vector<2x8x8xbf16>
    %36 = vector.extract_strided_slice %31 {offsets = [0, 0, 32], sizes = [2, 8, 8], strides = [1, 1, 1]} : vector<2x8x96xbf16> to vector<2x8x8xbf16>
    %37 = vector.extract_strided_slice %31 {offsets = [0, 0, 64], sizes = [2, 8, 8], strides = [1, 1, 1]} : vector<2x8x96xbf16> to vector<2x8x8xbf16>
    "tpu.trace_start"() <{level = 10 : i32, message = "btd,bsd->bts"}> : () -> ()
    %cst_13 = arith.constant dense<0.000000e+00> : vector<2x8x8xf32>
    %38 = tpu.matmul %35, %36, %cst_13 {dimension_numbers = #tpu.dot_dimension_numbers<[2], [2], [1], [1], [0, 0, 0, 1, 1, 1], [0], [0]>} : vector<2x8x8xbf16>, vector<2x8x8xbf16>, vector<2x8x8xf32> -> vector<2x8x8xf32>
    "tpu.trace_stop"() : () -> ()
    %cst_14 = arith.constant 0.353553385 : f32
    %39 = vector.broadcast %cst_14 : f32 to vector<2x8x8xf32>
    %40 = arith.mulf %38, %39 : vector<2x8x8xf32>
    %cst_15 = arith.constant -1.000000e+30 : f32
    %41 = vector.shape_cast %34 : vector<1x8x8xi1> to vector<1x8x8xi1>
    %42 = vector.broadcast %41 : vector<1x8x8xi1> to vector<2x8x8xi1>
    %43 = vector.broadcast %cst_15 : f32 to vector<2x8x8xf32>
    %44 = arith.select %42, %43, %40 : vector<2x8x8xi1>, vector<2x8x8xf32>
    %cst_16 = arith.constant dense<0xFF800000> : vector<2x8xf32>
    %45 = vector.multi_reduction <maximumf>, %44, %cst_16 [2] : vector<2x8x8xf32> to vector<2x8xf32>
    %46 = vector.shape_cast %45 : vector<2x8xf32> to vector<2x8x1xf32>
    %47 = vector.broadcast %46 : vector<2x8x1xf32> to vector<2x8x8xf32>
    %48 = arith.subf %44, %47 : vector<2x8x8xf32>
    %49 = math.exp %48 : vector<2x8x8xf32>
    %cst_17 = arith.constant dense<0.000000e+00> : vector<2x8xf32>
    %50 = vector.multi_reduction <add>, %49, %cst_17 [2] : vector<2x8x8xf32> to vector<2x8xf32>
    %51 = vector.shape_cast %50 : vector<2x8xf32> to vector<2x8x1xf32>
    %52 = tpu.reciprocal %51 {approx = true} : vector<2x8x1xf32> -> vector<2x8x1xf32>
    %53 = vector.broadcast %52 : vector<2x8x1xf32> to vector<2x8x8xf32>
    %54 = arith.mulf %49, %53 : vector<2x8x8xf32>
    %55 = arith.truncf %54 : vector<2x8x8xf32> to vector<2x8x8xbf16>
    "tpu.trace_start"() <{level = 10 : i32, message = "bts,bsd->btd"}> : () -> ()
    %cst_18 = arith.constant dense<0.000000e+00> : vector<2x8x8xf32>
    %56 = tpu.matmul %55, %37, %cst_18 {dimension_numbers = #tpu.dot_dimension_numbers<[2], [1], [1], [2], [0, 0, 0, 1, 1, 2], [0], [0]>} : vector<2x8x8xbf16>, vector<2x8x8xbf16>, vector<2x8x8xf32> -> vector<2x8x8xf32>
    "tpu.trace_stop"() : () -> ()
    %57 = vector.extract_strided_slice %31 {offsets = [0, 0, 8], sizes = [2, 8, 8], strides = [1, 1, 1]} : vector<2x8x96xbf16> to vector<2x8x8xbf16>
    %58 = vector.extract_strided_slice %31 {offsets = [0, 0, 40], sizes = [2, 8, 8], strides = [1, 1, 1]} : vector<2x8x96xbf16> to vector<2x8x8xbf16>
    %59 = vector.extract_strided_slice %31 {offsets = [0, 0, 72], sizes = [2, 8, 8], strides = [1, 1, 1]} : vector<2x8x96xbf16> to vector<2x8x8xbf16>
    "tpu.trace_start"() <{level = 10 : i32, message = "btd,bsd->bts"}> : () -> ()
    %cst_19 = arith.constant dense<0.000000e+00> : vector<2x8x8xf32>
    %60 = tpu.matmul %57, %58, %cst_19 {dimension_numbers = #tpu.dot_dimension_numbers<[2], [2], [1], [1], [0, 0, 0, 1, 1, 1], [0], [0]>} : vector<2x8x8xbf16>, vector<2x8x8xbf16>, vector<2x8x8xf32> -> vector<2x8x8xf32>
    "tpu.trace_stop"() : () -> ()
    %cst_20 = arith.constant 0.353553385 : f32
    %61 = vector.broadcast %cst_20 : f32 to vector<2x8x8xf32>
    %62 = arith.mulf %60, %61 : vector<2x8x8xf32>
    %cst_21 = arith.constant -1.000000e+30 : f32
    %63 = vector.shape_cast %34 : vector<1x8x8xi1> to vector<1x8x8xi1>
    %64 = vector.broadcast %63 : vector<1x8x8xi1> to vector<2x8x8xi1>
    %65 = vector.broadcast %cst_21 : f32 to vector<2x8x8xf32>
    %66 = arith.select %64, %65, %62 : vector<2x8x8xi1>, vector<2x8x8xf32>
    %cst_22 = arith.constant dense<0xFF800000> : vector<2x8xf32>
    %67 = vector.multi_reduction <maximumf>, %66, %cst_22 [2] : vector<2x8x8xf32> to vector<2x8xf32>
    %68 = vector.shape_cast %67 : vector<2x8xf32> to vector<2x8x1xf32>
    %69 = vector.broadcast %68 : vector<2x8x1xf32> to vector<2x8x8xf32>
    %70 = arith.subf %66, %69 : vector<2x8x8xf32>
    %71 = math.exp %70 : vector<2x8x8xf32>
    %cst_23 = arith.constant dense<0.000000e+00> : vector<2x8xf32>
    %72 = vector.multi_reduction <add>, %71, %cst_23 [2] : vector<2x8x8xf32> to vector<2x8xf32>
    %73 = vector.shape_cast %72 : vector<2x8xf32> to vector<2x8x1xf32>
    %74 = tpu.reciprocal %73 {approx = true} : vector<2x8x1xf32> -> vector<2x8x1xf32>
    %75 = vector.broadcast %74 : vector<2x8x1xf32> to vector<2x8x8xf32>
    %76 = arith.mulf %71, %75 : vector<2x8x8xf32>
    %77 = arith.truncf %76 : vector<2x8x8xf32> to vector<2x8x8xbf16>
    "tpu.trace_start"() <{level = 10 : i32, message = "bts,bsd->btd"}> : () -> ()
    %cst_24 = arith.constant dense<0.000000e+00> : vector<2x8x8xf32>
    %78 = tpu.matmul %77, %59, %cst_24 {dimension_numbers = #tpu.dot_dimension_numbers<[2], [1], [1], [2], [0, 0, 0, 1, 1, 2], [0], [0]>} : vector<2x8x8xbf16>, vector<2x8x8xbf16>, vector<2x8x8xf32> -> vector<2x8x8xf32>
    "tpu.trace_stop"() : () -> ()
    %79 = vector.extract_strided_slice %31 {offsets = [0, 0, 16], sizes = [2, 8, 8], strides = [1, 1, 1]} : vector<2x8x96xbf16> to vector<2x8x8xbf16>
    %80 = vector.extract_strided_slice %31 {offsets = [0, 0, 48], sizes = [2, 8, 8], strides = [1, 1, 1]} : vector<2x8x96xbf16> to vector<2x8x8xbf16>
    %81 = vector.extract_strided_slice %31 {offsets = [0, 0, 80], sizes = [2, 8, 8], strides = [1, 1, 1]} : vector<2x8x96xbf16> to vector<2x8x8xbf16>
    "tpu.trace_start"() <{level = 10 : i32, message = "btd,bsd->bts"}> : () -> ()
    %cst_25 = arith.constant dense<0.000000e+00> : vector<2x8x8xf32>
    %82 = tpu.matmul %79, %80, %cst_25 {dimension_numbers = #tpu.dot_dimension_numbers<[2], [2], [1], [1], [0, 0, 0, 1, 1, 1], [0], [0]>} : vector<2x8x8xbf16>, vector<2x8x8xbf16>, vector<2x8x8xf32> -> vector<2x8x8xf32>
    "tpu.trace_stop"() : () -> ()
    %cst_26 = arith.constant 0.353553385 : f32
    %83 = vector.broadcast %cst_26 : f32 to vector<2x8x8xf32>
    %84 = arith.mulf %82, %83 : vector<2x8x8xf32>
    %cst_27 = arith.constant -1.000000e+30 : f32
    %85 = vector.shape_cast %34 : vector<1x8x8xi1> to vector<1x8x8xi1>
    %86 = vector.broadcast %85 : vector<1x8x8xi1> to vector<2x8x8xi1>
    %87 = vector.broadcast %cst_27 : f32 to vector<2x8x8xf32>
    %88 = arith.select %86, %87, %84 : vector<2x8x8xi1>, vector<2x8x8xf32>
    %cst_28 = arith.constant dense<0xFF800000> : vector<2x8xf32>
    %89 = vector.multi_reduction <maximumf>, %88, %cst_28 [2] : vector<2x8x8xf32> to vector<2x8xf32>
    %90 = vector.shape_cast %89 : vector<2x8xf32> to vector<2x8x1xf32>
    %91 = vector.broadcast %90 : vector<2x8x1xf32> to vector<2x8x8xf32>
    %92 = arith.subf %88, %91 : vector<2x8x8xf32>
    %93 = math.exp %92 : vector<2x8x8xf32>
    %cst_29 = arith.constant dense<0.000000e+00> : vector<2x8xf32>
    %94 = vector.multi_reduction <add>, %93, %cst_29 [2] : vector<2x8x8xf32> to vector<2x8xf32>
    %95 = vector.shape_cast %94 : vector<2x8xf32> to vector<2x8x1xf32>
    %96 = tpu.reciprocal %95 {approx = true} : vector<2x8x1xf32> -> vector<2x8x1xf32>
    %97 = vector.broadcast %96 : vector<2x8x1xf32> to vector<2x8x8xf32>
    %98 = arith.mulf %93, %97 : vector<2x8x8xf32>
    %99 = arith.truncf %98 : vector<2x8x8xf32> to vector<2x8x8xbf16>
    "tpu.trace_start"() <{level = 10 : i32, message = "bts,bsd->btd"}> : () -> ()
    %cst_30 = arith.constant dense<0.000000e+00> : vector<2x8x8xf32>
    %100 = tpu.matmul %99, %81, %cst_30 {dimension_numbers = #tpu.dot_dimension_numbers<[2], [1], [1], [2], [0, 0, 0, 1, 1, 2], [0], [0]>} : vector<2x8x8xbf16>, vector<2x8x8xbf16>, vector<2x8x8xf32> -> vector<2x8x8xf32>
    "tpu.trace_stop"() : () -> ()
    %101 = vector.extract_strided_slice %31 {offsets = [0, 0, 24], sizes = [2, 8, 8], strides = [1, 1, 1]} : vector<2x8x96xbf16> to vector<2x8x8xbf16>
    %102 = vector.extract_strided_slice %31 {offsets = [0, 0, 56], sizes = [2, 8, 8], strides = [1, 1, 1]} : vector<2x8x96xbf16> to vector<2x8x8xbf16>
    %103 = vector.extract_strided_slice %31 {offsets = [0, 0, 88], sizes = [2, 8, 8], strides = [1, 1, 1]} : vector<2x8x96xbf16> to vector<2x8x8xbf16>
    "tpu.trace_start"() <{level = 10 : i32, message = "btd,bsd->bts"}> : () -> ()
    %cst_31 = arith.constant dense<0.000000e+00> : vector<2x8x8xf32>
    %104 = tpu.matmul %101, %102, %cst_31 {dimension_numbers = #tpu.dot_dimension_numbers<[2], [2], [1], [1], [0, 0, 0, 1, 1, 1], [0], [0]>} : vector<2x8x8xbf16>, vector<2x8x8xbf16>, vector<2x8x8xf32> -> vector<2x8x8xf32>
    "tpu.trace_stop"() : () -> ()
    %cst_32 = arith.constant 0.353553385 : f32
    %105 = vector.broadcast %cst_32 : f32 to vector<2x8x8xf32>
    %106 = arith.mulf %104, %105 : vector<2x8x8xf32>
    %cst_33 = arith.constant -1.000000e+30 : f32
    %107 = vector.shape_cast %34 : vector<1x8x8xi1> to vector<1x8x8xi1>
    %108 = vector.broadcast %107 : vector<1x8x8xi1> to vector<2x8x8xi1>
    %109 = vector.broadcast %cst_33 : f32 to vector<2x8x8xf32>
    %110 = arith.select %108, %109, %106 : vector<2x8x8xi1>, vector<2x8x8xf32>
    %cst_34 = arith.constant dense<0xFF800000> : vector<2x8xf32>
    %111 = vector.multi_reduction <maximumf>, %110, %cst_34 [2] : vector<2x8x8xf32> to vector<2x8xf32>
    %112 = vector.shape_cast %111 : vector<2x8xf32> to vector<2x8x1xf32>
    %113 = vector.broadcast %112 : vector<2x8x1xf32> to vector<2x8x8xf32>
    %114 = arith.subf %110, %113 : vector<2x8x8xf32>
    %115 = math.exp %114 : vector<2x8x8xf32>
    %cst_35 = arith.constant dense<0.000000e+00> : vector<2x8xf32>
    %116 = vector.multi_reduction <add>, %115, %cst_35 [2] : vector<2x8x8xf32> to vector<2x8xf32>
    %117 = vector.shape_cast %116 : vector<2x8xf32> to vector<2x8x1xf32>
    %118 = tpu.reciprocal %117 {approx = true} : vector<2x8x1xf32> -> vector<2x8x1xf32>
    %119 = vector.broadcast %118 : vector<2x8x1xf32> to vector<2x8x8xf32>
    %120 = arith.mulf %115, %119 : vector<2x8x8xf32>
    %121 = arith.truncf %120 : vector<2x8x8xf32> to vector<2x8x8xbf16>
    "tpu.trace_start"() <{level = 10 : i32, message = "bts,bsd->btd"}> : () -> ()
    %cst_36 = arith.constant dense<0.000000e+00> : vector<2x8x8xf32>
    %122 = tpu.matmul %121, %103, %cst_36 {dimension_numbers = #tpu.dot_dimension_numbers<[2], [1], [1], [2], [0, 0, 0, 1, 1, 2], [0], [0]>} : vector<2x8x8xbf16>, vector<2x8x8xbf16>, vector<2x8x8xf32> -> vector<2x8x8xf32>
    "tpu.trace_stop"() : () -> ()
    %123 = tpu.concatenate %56, %78, %100, %122 in 2 : vector<2x8x8xf32>, vector<2x8x8xf32>, vector<2x8x8xf32>, vector<2x8x8xf32> -> vector<2x8x32xf32>
    %124 = vector.shape_cast %123 : vector<2x8x32xf32> to vector<16x32xf32>
    %125 = arith.truncf %124 : vector<16x32xf32> to vector<16x32xbf16>
    %c0_37 = arith.constant 0 : index
    %c0_38 = arith.constant 0 : index
    %126 = vector.load %arg3[%c0_37, %c0_38] : memref<32x32xbf16, #tpu.memory_space<vmem>>, vector<32x32xbf16>
    %cst_39 = arith.constant dense<0.000000e+00> : vector<16x32xf32>
    %127 = tpu.matmul %125, %126, %cst_39 {dimension_numbers = #tpu.dot_dimension_numbers<[1], [0], [0], [1], [0, 0, 1, 1], [], []>} : vector<16x32xbf16>, vector<32x32xbf16>, vector<16x32xf32> -> vector<16x32xf32>
    %128 = arith.addf %0, %127 : vector<16x32xf32>
    %cst_40 = arith.constant dense<0.000000e+00> : vector<16xf32>
    %129 = vector.multi_reduction <add>, %128, %cst_40 [1] : vector<16x32xf32> to vector<16xf32>
    %130 = vector.shape_cast %129 : vector<16xf32> to vector<16x1xf32>
    %cst_41 = arith.constant 3.200000e+01 : f32
    %131 = vector.broadcast %cst_41 : f32 to vector<16x1xf32>
    %132 = arith.divf %130, %131 : vector<16x1xf32>
    %133 = vector.broadcast %132 : vector<16x1xf32> to vector<16x32xf32>
    %134 = arith.subf %128, %133 : vector<16x32xf32>
    %135 = arith.mulf %134, %134 : vector<16x32xf32>
    %cst_42 = arith.constant dense<0.000000e+00> : vector<16xf32>
    %136 = vector.multi_reduction <add>, %135, %cst_42 [1] : vector<16x32xf32> to vector<16xf32>
    %137 = vector.shape_cast %136 : vector<16xf32> to vector<16x1xf32>
    %cst_43 = arith.constant 3.200000e+01 : f32
    %138 = vector.broadcast %cst_43 : f32 to vector<16x1xf32>
    %139 = arith.divf %137, %138 : vector<16x1xf32>
    %140 = vector.broadcast %132 : vector<16x1xf32> to vector<16x32xf32>
    %141 = arith.subf %128, %140 : vector<16x32xf32>
    %cst_44 = arith.constant 9.99999974E-6 : f32
    %142 = vector.broadcast %cst_44 : f32 to vector<16x1xf32>
    %143 = arith.addf %139, %142 : vector<16x1xf32>
    %144 = math.rsqrt %143 : vector<16x1xf32>
    %145 = vector.broadcast %144 : vector<16x1xf32> to vector<16x32xf32>
    %146 = arith.mulf %141, %145 : vector<16x32xf32>
    %147 = vector.broadcast %3 : vector<1x32xf32> to vector<16x32xf32>
    %148 = arith.mulf %146, %147 : vector<16x32xf32>
    %149 = vector.broadcast %4 : vector<1x32xf32> to vector<16x32xf32>
    %150 = arith.addf %148, %149 : vector<16x32xf32>
    %151 = arith.truncf %150 : vector<16x32xf32> to vector<16x32xbf16>
    %c0_45 = arith.constant 0 : index
    %c0_46 = arith.constant 0 : index
    %152 = vector.load %arg4[%c0_45, %c0_46] : memref<32x128xbf16, #tpu.memory_space<vmem>>, vector<32x128xbf16>
    %cst_47 = arith.constant dense<0.000000e+00> : vector<16x128xf32>
    %153 = tpu.matmul %151, %152, %cst_47 {dimension_numbers = #tpu.dot_dimension_numbers<[1], [0], [0], [1], [0, 0, 1, 1], [], []>} : vector<16x32xbf16>, vector<32x128xbf16>, vector<16x128xf32> -> vector<16x128xf32>
    %cst_48 = arith.constant 5.000000e-01 : f32
    %154 = vector.broadcast %cst_48 : f32 to vector<16x128xf32>
    %155 = arith.mulf %154, %153 : vector<16x128xf32>
    %cst_49 = arith.constant 2.000000e+00 : f32
    %156 = math.sqrt %cst_49 : f32
    %cst_50 = arith.constant 1.000000e+00 : f32
    %157 = arith.divf %cst_50, %156 : f32
    %158 = vector.broadcast %157 : f32 to vector<16x128xf32>
    %159 = arith.mulf %153, %158 : vector<16x128xf32>
    %160 = math.erf %159 : vector<16x128xf32>
    %cst_51 = arith.constant 1.000000e+00 : f32
    %161 = vector.broadcast %cst_51 : f32 to vector<16x128xf32>
    %162 = arith.addf %161, %160 : vector<16x128xf32>
    %163 = arith.mulf %155, %162 : vector<16x128xf32>
    %164 = arith.truncf %163 : vector<16x128xf32> to vector<16x128xbf16>
    %c0_52 = arith.constant 0 : index
    %c0_53 = arith.constant 0 : index
    %165 = vector.load %arg5[%c0_52, %c0_53] : memref<128x32xbf16, #tpu.memory_space<vmem>>, vector<128x32xbf16>
    %cst_54 = arith.constant dense<0.000000e+00> : vector<16x32xf32>
    %166 = tpu.matmul %164, %165, %cst_54 {dimension_numbers = #tpu.dot_dimension_numbers<[1], [0], [0], [1], [0, 0, 1, 1], [], []>} : vector<16x128xbf16>, vector<128x32xbf16>, vector<16x32xf32> -> vector<16x32xf32>
    %167 = arith.addf %128, %166 : vector<16x32xf32>
    %c0_55 = arith.constant 0 : index
    %c0_56 = arith.constant 0 : index
    %168 = vector.load %arg7[%c0_55, %c0_56] : memref<16x32xf32, #tpu.memory_space<vmem>>, vector<16x32xf32>
    tpu.vector_store %arg7[%c0_55, %c0_56], %167 {strides = array<i32>} : memref<16x32xf32, #tpu.memory_space<vmem>>, vector<16x32xf32>,
    return
  }
  func.func @transform_0(%arg0: i32) -> (i32, i32) {
    %c0_i32 = arith.constant 0 : i32
    %c0_i32_0 = arith.constant 0 : i32
    %c0_i32_1 = arith.constant 0 : i32
    return %c0_i32, %c0_i32_0 : i32, i32
  }
  func.func @transform_1(%arg0: i32) -> (i32, i32) {
    %c0_i32 = arith.constant 0 : i32
    %c0_i32_0 = arith.constant 0 : i32
    %c0_i32_1 = arith.constant 0 : i32
    return %c0_i32, %c0_i32_0 : i32, i32
  }
  func.func @transform_2(%arg0: i32) -> (i32, i32) {
    %c0_i32 = arith.constant 0 : i32
    %c0_i32_0 = arith.constant 0 : i32
    %c0_i32_1 = arith.constant 0 : i32
    return %c0_i32, %c0_i32_0 : i32, i32
  }
  func.func @transform_3(%arg0: i32) -> (i32, i32) {
    %c0_i32 = arith.constant 0 : i32
    %c0_i32_0 = arith.constant 0 : i32
    %c0_i32_1 = arith.constant 0 : i32
    return %c0_i32, %c0_i32_0 : i32, i32
  }
  func.func @transform_4(%arg0: i32) -> (i32, i32) {
    %c0_i32 = arith.constant 0 : i32
    %c0_i32_0 = arith.constant 0 : i32
    %c0_i32_1 = arith.constant 0 : i32
    return %c0_i32, %c0_i32_0 : i32, i32
  }
  func.func @transform_5(%arg0: i32) -> (i32, i32) {
    %c0_i32 = arith.constant 0 : i32
    %c0_i32_0 = arith.constant 0 : i32
    %c0_i32_1 = arith.constant 0 : i32
    return %c0_i32, %c0_i32_0 : i32, i32
  }
  func.func @transform_6(%arg0: i32) -> (i32, i32) {
    %c0_i32 = arith.constant 0 : i32
    %c0_i32_0 = arith.constant 0 : i32
    %c0_i32_1 = arith.constant 0 : i32
    return %c0_i32, %c0_i32_0 : i32, i32
  }
}

</mosaic_0001>

<bundles_post_ra>
// kernel: tpu_custom_call.1
= control target key start
LH: loop header
LB: loop body
LE: loop exit
PB: predicated region body
PF: predicated region fallthrough
CT: control target
= control target key end

     0   :  { %vm31_vm0 = vcmask 261120   ;;  %s1448_s0 = inlined_call_operand.vmem [shape: f32[16,32], index: 0, kind: input, shape index: {}]   ;;  %s1449_s1 = inlined_call_operand.vmem [shape: bf16[32,96], index: 1, kind: input, shape index: {}]   ;;  %s1450_s2 = inlined_call_operand.vmem [shape: bf16[32,32], index: 2, kind: input, shape index: {}]   ;;  %s1451_s3 = inlined_call_operand.vmem [shape: bf16[32,128], index: 3, kind: input, shape index: {}]   ;;  %s1452_s4 = inlined_call_operand.vmem [shape: bf16[128,32], index: 4, kind: input, shape index: {}]   ;;  %s1453_s5 = inlined_call_operand.vmem [shape: f32[4,32], index: 5, kind: input, shape index: {}]   ;;  %s1454_s6 = inlined_call_operand.hbm [shape: f32[16,32], index: 6, kind: output, shape index: {}]  }
   0x1   :  { %v1195_v0 = vld [vmem:[%s1448_s0] sm:$0xff] }
   0x2   :  { %v32_v1 = vsel %vm31_vm0, %v1195_v0, 0.0 }
   0x3   :  { %33 = vadd.xlane.f32.xlu0 %v32_v1 }
   0x4   :  { %11 = vsyncpa [#allocation3], 0  ;;  %v1202_v2 = vld [vmem:[%s1448_s0 + $0x8] sm:$0xff]  ;;  %v1140_v4 = vmov 32.0   ;;  %v1018_v23 = vld [vmem:[%s1449_s1] sm:$0xff]  ;;  %s1141_s7 = smov 120  }
   0x5   :  { %v35_v3 = vsel %vm31_vm0, %v1202_v2, 0.0  ;;  %1068 = vrcp.f32 %v1140_v4  ;;  %v1019_v21 = vld [vmem:[%s1449_s1 + $0x8] sm:$0xff]  ;;  %v1064_v42 = vld [vmem:[%s1453_s5] ss:$0 sm:$0xff]  ;;  %v1065_v47 = vld [vmem:[%s1453_s5 + $0x1] ss:$0 sm:$0xff] }
   0x6   :  { %115 = vmatpush.bf16.msra.mxu0 %v1019_v21  ;;  %s1142_s8 = smov 88   ;;  %s1143_s9 = smov 96   ;;  %vm135_vm8 = vcmask 64512   ;;  %vm214_vm9 = vcmask 1043456   ;;  %vm626_vm11 = vcmask 130048   ;;  %vm629_vm12 = vcmask 195584  }
   0x7   :  { %s1144_s10 = smov 112   ;;  %s1145_s11 = smov 80  }
   0x8   :  { %s1146_s12 = smov 104   ;;  %s1147_s13 = smov 72  }
   0x9   :  { %s1148_s14 = smov 64   ;;  %s1149_s15 = smov 48  }
   0xa   :  { %116 = vmatpush.bf16.msra.mxu0 %v1018_v23  ;;  %v125_v23 = vlaneseq  ;;  %s1150_s16 = smov 56   ;;  %s1151_s17 = smov 40  }
   0xb   :  { %36 = vadd.xlane.f32.xlu0 %v35_v3  ;;  %v1069_v5 = vpop.eup %1068  ;;  %s1152_s18 = smov 8   ;;  %s1153_s19 = smov 16  }
   0xc   :  { %v39_v6 = vmul.f32 32.0, %v1069_v5  ;;  %vm43_vm1 = vweird.f32 %v1069_v5  ;;  %s1154_s20 = smov 24   ;;  %s929_s24 = sshll.u32 %s1454_s6, 4  ;;  %s930_s24 = int_to_ptr.hbm [resolvable:$true] %s929_s24 }
   0xe   :  { %v40_v7 = vsub.f32 1.0, %v39_v6 }
  0x10   :  { %v41_v8 = vmul.f32 %v1069_v5, %v40_v7 }
  0x12   :  { %v42_v9 = vadd.f32 %v1069_v5, %v41_v8 }
  0x14   :  { %v1206_v10 = vsel %vm43_vm1, %v1069_v5, %v42_v9 }
  0x76   :  { %v34_v11 = vpop.xlane.xlu0 %33 }
  0x77   :  { %v45_v12 = vmul.f32 %v1206_v10, %v34_v11 }
  0x79   :  { %v47_v13 = vsub.f32 %v1195_v0, %v45_v12 }
  0x7b   :  { %v49_v14 = vmul.f32 %v47_v13, %v47_v13 }
  0x7d   :  { %v51_v15 = vsel %vm31_vm0, %v49_v14, 0.0 }
  0x7e   :  { %52 = vadd.xlane.f32.xlu1 %v51_v15  ;;  %v37_v16 = vpop.xlane.xlu0 %36 }
  0x7f   :  { %v46_v17 = vmul.f32 %v1206_v10, %v37_v16 }
  0x81   :  { %v48_v18 = vsub.f32 %v1202_v2, %v46_v17 }
  0x83   :  { %v50_v19 = vmul.f32 %v48_v18, %v48_v18 }
  0x85   :  { %v54_v20 = vsel %vm31_vm0, %v50_v19, 0.0 }
  0x86   :  { %55 = vadd.xlane.f32.xlu1 %v54_v20 }
  0xf1   :  { %v53_v22 = vpop.xlane.xlu1 %52 }
  0xf2   :  { %v57_v24 = vmul.f32 %v53_v22, %v1206_v10 }
  0xf4   :  { %v59_v25 = vadd.f32 1e-05, %v57_v24  ;;  %v126_v24 = vshrl.u32 %v125_v23, 7 }
  0xf6   :  { %1070 = vrsqrt.f32 %v59_v25  ;;  %vm67_vm3 = vweird.f32 %v59_v25 }
  0xf9   :  { %v56_v26 = vpop.xlane.xlu1 %55 }
  0xfa   :  { %v58_v27 = vmul.f32 %v56_v26, %v1206_v10 }
  0xfc   :  { %v1071_v28 = vpop.eup %1070  ;;  %v60_v29 = vadd.f32 1e-05, %v58_v27 }
  0xfd   :  { %v62_v30 = vmul.f32 %v1071_v28, %v59_v25  ;;  %vm68_vm2 = vweird.f32 %v1071_v28  ;;  %v128_v25 = vand.u32 127, %v125_v23 }
  0xfe   :  { %1072 = vrsqrt.f32 %v60_v29  ;;  %vm69_vm4 = vmor %vm67_vm3, %vm68_vm2  ;;  %vm77_vm6 = vweird.f32 %v60_v29 }
  0xff   :  { %v63_v31 = vmul.f32 %v1071_v28, %v62_v30  ;;  %vm1266_vm10 = vcmp.gt.s32.totalorder %v128_v25, %v126_v24 }
 0x101   :  { %v64_v32 = vmul.f32 0.5, %v63_v31 }
 0x103   :  { %v65_v33 = vsub.f32 1.5, %v64_v32 }
 0x104   :  { %v1073_v34 = vpop.eup %1072 }
 0x105   :  { %v66_v35 = vmul.f32 %v1071_v28, %v65_v33  ;;  %v72_v36 = vmul.f32 %v1073_v34, %v60_v29  ;;  %vm78_vm5 = vweird.f32 %v1073_v34 }
 0x106   :  { %vm79_vm7 = vmor %vm77_vm6, %vm78_vm5 }
 0x107   :  { %v73_v37 = vmul.f32 %v1073_v34, %v72_v36  ;;  %v70_v38 = vsel %vm69_vm4, %v1071_v28, %v66_v35 }
 0x108   :  { %v81_v41 = vmul.f32 %v70_v38, %v47_v13 }
 0x109   :  { %v74_v39 = vmul.f32 0.5, %v73_v37 }
 0x10a   :  { %v84_v46 = vmul.f32 %v1064_v42, %v81_v41 }
 0x10b   :  { %v75_v40 = vsub.f32 1.5, %v74_v39 }
 0x10c   :  { %v87_v49 = vadd.f32 %v1065_v47, %v84_v46 }
 0x10d   :  { %v76_v43 = vmul.f32 %v1073_v34, %v75_v40 }
 0x10f   :  { %v80_v44 = vsel %vm79_vm7, %v1073_v34, %v76_v43 }
 0x110   :  { %v82_v45 = vmul.f32 %v80_v44, %v48_v18 }
 0x112   :  { %v85_v48 = vmul.f32 %v1064_v42, %v82_v45 }
 0x114   :  { %v88_v50 = vadd.f32 %v1065_v47, %v85_v48 }
 0x116   :  { %v89_v51 = vpack.c.bf16 %v88_v50, %v87_v49 }
 0x118   :  { %949 = vmatmul.msk.bf16.vlgmr.msra.gmra.mxu0 %vm31_vm0, %v89_v51 }
 0x195   :  { %v118_v52 = vpop.f32.mrf.mxu0 }
 0x196   :  { %v123_v53 = vpack.c.bf16 %v118_v52, %v118_v52 }
 0x198   :  { %v131_v54 = vunpack.c.l.b16 %v123_v53 }
 0x19a   :  { %v1229_v55 = vpack.c.b16 %v131_v54, %v131_v54 }
 0x19c   :  { %252 = vrot.lane.b32.xlu1 %v1229_v55, %s1141_s7  ;;  %254 = vrot.lane.b32.xlu0 %v1229_v55, %s1142_s8 }
 0x19d   :  { %133 = vrot.lane.b32.xlu2 %v1229_v55, %s1143_s9  ;;  %v120_v56 = vpop.f32.mrf.mxu0 }
 0x19e   :  { %v124_v57 = vpack.c.bf16 %v120_v56, %v120_v56 }
 0x1a0   :  { %v156_v58 = vunpack.c.l.b16 %v124_v57 }
 0x1a2   :  { %v1234_v59 = vpack.c.b16 %v156_v58, %v156_v58 }
 0x1a4   :  { %391 = vrot.lane.b32.xlu1 %v1234_v59, %s1144_s10  ;;  %393 = vrot.lane.b32.xlu0 %v1234_v59, %s1145_s11 }
 0x1a5   :  { %158 = vrot.lane.b32.xlu2 %v1234_v59, %s1143_s9 }
 0x1ac   :  { %484 = vrot.lane.b32.xlu1 %v1229_v55, %s1146_s12  ;;  %486 = vrot.lane.b32.xlu0 %v1229_v55, %s1147_s13 }
 0x1ad   :  { %277 = vrot.lane.b32.xlu2 %v1234_v59, %s1142_s8 }
 0x1b4   :  { %507 = vrot.lane.b32.xlu0 %v1234_v59, %s1146_s12 }
 0x1b5   :  { %275 = vrot.lane.b32.xlu2 %v1234_v59, %s1141_s7 }
 0x1bc   :  { %209 = vrot.lane.b32.xlu0 %v1229_v55, %s1148_s14 }
 0x1bd   :  { %370 = vrot.lane.b32.xlu2 %v1229_v55, %s1145_s11 }
 0x1c5   :  { %368 = vrot.lane.b32.xlu2 %v1229_v55, %s1144_s10 }
 0x1cd   :  { %509 = vrot.lane.b32.xlu2 %v1234_v59, %s1147_s13 }
 0x1f7   :  { %v134_v60 = vpop.permute.xlu2 %133 }
 0x1f8   :  { %v140_v61 = vsel %vm135_vm8, %v134_v60, 0 }
 0x1f9   :  { %149 = vmatpush.bf16.xpose.msra.mxu1 %v140_v61 }
 0x1ff   :  { %v159_v62 = vpop.permute.xlu2 %158 }
 0x200   :  { %950 = vmatmul.msk.bf16.vlgmr.msra.gmra.mxu1 %vm135_vm8, %v123_v53  ;;  %v164_v63 = vsel %vm135_vm8, %v159_v62, 0 }
 0x201   :  { %173 = vmatpush.bf16.xpose.msra.mxu2 %v164_v63 }
 0x207   :  { %v278_v1 = vpop.permute.xlu2 %277 }
 0x208   :  { %951 = vmatmul.msk.bf16.vlgmr.msra.gmra.mxu2 %vm135_vm8, %v124_v57  ;;  %v283_v3 = vsel %vm135_vm8, %v278_v1, 0 }
 0x209   :  { %292 = vmatpush.bf16.xpose.msrb.mxu1 %v283_v3 }
 0x20e   :  { %v255_v4 = vpop.permute.xlu0 %254  ;;  %v253_v7 = vpop.permute.xlu1 %252 }
 0x20f   :  { %v276_v5 = vpop.permute.xlu2 %275  ;;  %v260_v6 = vsel %vm135_vm8, %v255_v4, 0 }
 0x210   :  { %955 = vmatmul.msk.bf16.vlgmr.msrb.gmra.mxu1 %vm135_vm8, %v276_v5  ;;  %269 = vmatpush.bf16.xpose.msrb.mxu0 %v260_v6 }
 0x216   :  { %v394_v8 = vpop.permute.xlu0 %393  ;;  %v392_v14 = vpop.permute.xlu1 %391 }
 0x217   :  { %v399_v9 = vsel %vm135_vm8, %v394_v8, 0  ;;  %v371_v11 = vpop.permute.xlu2 %370  ;;  %954 = vmatmul.msk.bf16.vlgmr.msrb.gmra.mxu0 %vm135_vm8, %v253_v7 }
 0x218   :  { %v376_v12 = vsel %vm135_vm8, %v371_v11, 0  ;;  %408 = vmatpush.bf16.xpose.msra.mxu1 %v399_v9 }
 0x219   :  { %385 = vmatpush.bf16.xpose.msra.mxu0 %v376_v12 }
 0x21e   :  { %v487_v13 = vpop.permute.xlu0 %486  ;;  %v485_v22 = vpop.permute.xlu1 %484 }
 0x21f   :  { %v492_v15 = vsel %vm135_vm8, %v487_v13, 0  ;;  %v369_v16 = vpop.permute.xlu2 %368 }
 0x220   :  { %959 = vmatmul.msk.bf16.vlgmr.msra.gmra.mxu1 %vm135_vm8, %v392_v14 }
 0x221   :  { %501 = vmatpush.bf16.xpose.msrb.mxu0 %v492_v15 }
 0x226   :  { %v508_v17 = vpop.permute.xlu0 %507 }
 0x227   :  { %v510_v18 = vpop.permute.xlu2 %509  ;;  %958 = vmatmul.msk.bf16.vlgmr.msra.gmra.mxu0 %vm135_vm8, %v369_v16 }
 0x228   :  { %v515_v19 = vsel %vm135_vm8, %v510_v18, 0 }
 0x229   :  { %524 = vmatpush.bf16.xpose.msrb.mxu1 %v515_v19 }
 0x22e   :  { %v210_v20 = vpop.permute.xlu0 %209 }
 0x22f   :  { %v216_v21 = vsel %vm214_vm9, %v210_v20, 0 }
 0x230   :  { %963 = vmatmul.msk.bf16.vlgmr.msrb.gmra.mxu1 %vm135_vm8, %v508_v17  ;;  %225 = vmatpush.bf16.msra.mxu3 %v216_v21 }
 0x237   :  { %962 = vmatmul.msk.bf16.vlgmr.msrb.gmra.mxu0 %vm135_vm8, %v485_v22 }
 0x27d   :  { %v151_v26 = vpop.f32.mrf.mxu1 }
 0x27e   :  { %v179_v28 = vmul.f32 0.35355338, %v151_v26 }
 0x280   :  { %v183_v29 = vsel %vm1266_vm10, -1e+30, %v179_v28 }
 0x281   :  { %v185_v30 = vsel %vm135_vm8, %v183_v29, -inf }
 0x282   :  { %186 = vmax.xlane.f32.xlu2 %v185_v30 }
 0x285   :  { %v153_v31 = vpop.f32.mrf.mxu1 }
 0x28b   :  { %v175_v32 = vpop.f32.mrf.mxu2 }
 0x28c   :  { %v180_v33 = vmul.f32 0.35355338, %v175_v32 }
 0x28d   :  { %v294_v34 = vpop.f32.mrf.mxu1 }
 0x28e   :  { %v299_v35 = vmul.f32 0.35355338, %v294_v34  ;;  %v184_v36 = vsel %vm1266_vm10, -1e+30, %v180_v33 }
 0x28f   :  { %v188_v37 = vsel %vm135_vm8, %v184_v36, -inf }
 0x290   :  { %189 = vmax.xlane.f32.xlu1 %v188_v37  ;;  %v1278_v38 = vsel %vm1266_vm10, -1e+30, %v299_v35 }
 0x291   :  { %v305_v39 = vsel %vm135_vm8, %v1278_v38, -inf }
 0x292   :  { %306 = vmax.xlane.f32.xlu2 %v305_v39 }
 0x293   :  { %v177_v40 = vpop.f32.mrf.mxu2 }
 0x294   :  { %v271_v41 = vpop.f32.mrf.mxu0 }
 0x295   :  { %v298_v42 = vmul.f32 0.35355338, %v271_v41  ;;  %v296_v43 = vpop.f32.mrf.mxu1 }
 0x297   :  { %v300_v44 = vsel %vm1266_vm10, -1e+30, %v298_v42 }
 0x298   :  { %v302_v45 = vsel %vm135_vm8, %v300_v44, -inf }
 0x299   :  { %303 = vmax.xlane.f32.xlu0 %v302_v45 }
 0x29c   :  { %v273_v46 = vpop.f32.mrf.mxu0 }
 0x29d   :  { %v410_v47 = vpop.f32.mrf.mxu1 }
 0x29e   :  { %v415_v48 = vmul.f32 0.35355338, %v410_v47 }
 0x2a0   :  { %v1287_v49 = vsel %vm1266_vm10, -1e+30, %v415_v48 }
 0x2a1   :  { %v421_v50 = vsel %vm135_vm8, %v1287_v49, -inf }
 0x2a2   :  { %422 = vmax.xlane.f32.xlu1 %v421_v50 }
 0x2a4   :  { %v387_v51 = vpop.f32.mrf.mxu0 }
 0x2a5   :  { %v414_v52 = vmul.f32 0.35355338, %v387_v51  ;;  %v412_v53 = vpop.f32.mrf.mxu1 }
 0x2a7   :  { %v416_v54 = vsel %vm1266_vm10, -1e+30, %v414_v52 }
 0x2a8   :  { %v418_v56 = vsel %vm135_vm8, %v416_v54, -inf }
 0x2a9   :  { %419 = vmax.xlane.f32.xlu2 %v418_v56 }
 0x2ac   :  { %v389_v57 = vpop.f32.mrf.mxu0 }
 0x2ad   :  { %v526_v58 = vpop.f32.mrf.mxu1 }
 0x2ae   :  { %v531_v60 = vmul.f32 0.35355338, %v526_v58 }
 0x2b0   :  { %v1296_v61 = vsel %vm1266_vm10, -1e+30, %v531_v60 }
 0x2b1   :  { %v537_v62 = vsel %vm135_vm8, %v1296_v61, -inf }
 0x2b2   :  { %538 = vmax.xlane.f32.xlu0 %v537_v62 }
 0x2b4   :  { %v503_v63 = vpop.f32.mrf.mxu0 }
 0x2b5   :  { %v530_v1 = vmul.f32 0.35355338, %v503_v63  ;;  %v528_v3 = vpop.f32.mrf.mxu1 }
 0x2b7   :  { %v532_v4 = vsel %vm1266_vm10, -1e+30, %v530_v1 }
 0x2b8   :  { %v534_v5 = vsel %vm135_vm8, %v532_v4, -inf }
 0x2b9   :  { %535 = vmax.xlane.f32.xlu2 %v534_v5 }
 0x2bc   :  { %v505_v6 = vpop.f32.mrf.mxu0 }
 0x2c6   :  { %442 = vrot.lane.b32.xlu0 %v1229_v55, %s1149_s15 }
 0x2d1   :  { %326 = vrot.lane.b32.xlu2 %v1229_v55, %s1150_s16 }
 0x2f5   :  { %v187_v7 = vpop.xlane.xlu2 %186 }
 0x2f6   :  { %v191_v8 = vsub.f32 %v183_v29, %v187_v7 }
 0x2f8   :  { %v193_v9 = vmul.f32 1.442695, %v191_v8 }
 0x2fa   :  { %1074 = vpow2.f32 %v193_v9 }
 0x300   :  { %v1075_v11 = vpop.eup %1074 }
 0x301   :  { %v197_v12 = vsel %vm135_vm8, %v1075_v11, 0.0 }
 0x302   :  { %198 = vadd.xlane.f32.xlu1 %v197_v12 }
 0x303   :  { %v190_v13 = vpop.xlane.xlu1 %189 }
 0x304   :  { %v192_v16 = vsub.f32 %v184_v36, %v190_v13 }
 0x305   :  { %v307_v19 = vpop.xlane.xlu2 %306 }
 0x306   :  { %v195_v18 = vmul.f32 1.442695, %v192_v16  ;;  %v309_v33 = vsub.f32 %v1278_v38, %v307_v19 }
 0x308   :  { %v312_v35 = vmul.f32 1.442695, %v309_v33 }
 0x30c   :  { %v304_v14 = vpop.xlane.xlu0 %303 }
 0x30d   :  { %v308_v15 = vsub.f32 %v300_v44, %v304_v14 }
 0x30f   :  { %v310_v17 = vmul.f32 1.442695, %v308_v15 }
 0x311   :  { %1076 = vpow2.f32 %v310_v17 }
 0x312   :  { %1078 = vpow2.f32 %v195_v18 }
 0x315   :  { %v423_v38 = vpop.xlane.xlu1 %422 }
 0x316   :  { %v425_v42 = vsub.f32 %v1287_v49, %v423_v38 }
 0x317   :  { %v1308_v20 = vpop.eup %1076 }
 0x318   :  { %v314_v21 = vsel %vm135_vm8, %v1308_v20, 0.0  ;;  %v1079_v23 = vpop.eup %1078  ;;  %v428_v43 = vmul.f32 1.442695, %v425_v42 }
 0x319   :  { %315 = vadd.xlane.f32.xlu2 %v314_v21  ;;  %v200_v26 = vsel %vm135_vm8, %v1079_v23, 0.0 }
 0x31b   :  { %231 = vrot.lane.b32.xlu1 %v1234_v59, %s1148_s14 }
 0x31c   :  { %v420_v22 = vpop.xlane.xlu2 %419 }
 0x31d   :  { %v424_v24 = vsub.f32 %v416_v54, %v420_v22 }
 0x31f   :  { %v426_v25 = vmul.f32 1.442695, %v424_v24 }
 0x321   :  { %1080 = vpow2.f32 %v426_v25  ;;  %201 = vadd.xlane.f32.xlu2 %v200_v26 }
 0x325   :  { %v539_v32 = vpop.xlane.xlu0 %538 }
 0x326   :  { %v541_v47 = vsub.f32 %v1296_v61, %v539_v32 }
 0x327   :  { %v1315_v27 = vpop.eup %1080 }
 0x328   :  { %v430_v28 = vsel %vm135_vm8, %v1315_v27, 0.0  ;;  %v544_v48 = vmul.f32 1.442695, %v541_v47 }
 0x329   :  { %431 = vadd.xlane.f32.xlu0 %v430_v28 }
 0x32c   :  { %v536_v29 = vpop.xlane.xlu2 %535 }
 0x32d   :  { %v540_v30 = vsub.f32 %v532_v4, %v536_v29 }
 0x32f   :  { %v542_v31 = vmul.f32 1.442695, %v540_v30 }
 0x331   :  { %1082 = vpow2.f32 %v542_v31 }
 0x332   :  { %1084 = vpow2.f32 %v312_v35 }
 0x333   :  { %1086 = vpow2.f32 %v428_v43 }
 0x334   :  { %v327_v53 = vpop.permute.xlu2 %326 }
 0x335   :  { %v332_v58 = vsel %vm214_vm9, %v327_v53, 0  ;;  %v1020_v53 = vld [vmem:[%s1450_s2] sm:$0xff] }
 0x337   :  { %v1320_v34 = vpop.eup %1082 }
 0x338   :  { %v443_v36 = vpop.permute.xlu0 %442  ;;  %v546_v37 = vsel %vm135_vm8, %v1320_v34, 0.0  ;;  %v1085_v40 = vpop.eup %1084 }
 0x339   :  { %347 = vrot.lane.b32.xlu2 %v1234_v59, %s1150_s16  ;;  %v448_v39 = vsel %vm214_vm9, %v443_v36, 0  ;;  %547 = vadd.xlane.f32.xlu0 %v546_v37  ;;  %v317_v41 = vsel %vm135_vm8, %v1085_v40, 0.0  ;;  %v1330_v44 = vpop.eup %1086 }
 0x33a   :  { %457 = vmatpush.bf16.msrb.mxu2 %v448_v39  ;;  %v433_v45 = vsel %vm135_vm8, %v1330_v44, 0.0 }
 0x345   :  { %318 = vadd.xlane.f32.xlu1 %v317_v41 }
 0x34d   :  { %579 = vrot.lane.b32.xlu0 %v1234_v59, %s1151_s17 }
 0x35e   :  { %463 = vrot.lane.b32.xlu1 %v1234_v59, %s1149_s15 }
 0x362   :  { %434 = vadd.xlane.f32.xlu2 %v433_v45 }
 0x375   :  { %v199_v46 = vpop.xlane.xlu1 %198 }
 0x376   :  { %1088 = vrcp.f32 %v199_v46 }
 0x377   :  { %1090 = vpow2.f32 %v544_v48 }
 0x37a   :  { %558 = vrot.lane.b32.xlu2 %v1229_v55, %s1151_s17 }
 0x37c   :  { %v1089_v50 = vpop.eup %1088 }
 0x37d   :  { %v205_v49 = vmul.f32 %v1089_v50, %v1075_v11  ;;  %v1091_v52 = vpop.eup %1090 }
 0x37e   :  { %v549_v59 = vsel %vm135_vm8, %v1091_v52, 0.0 }
 0x37f   :  { %v207_v51 = vpack.c.bf16 %v205_v49, %v205_v49 }
 0x381   :  { %952 = vmatmul.msk.bf16.vlgmr.msra.gmra.mxu3 %vm135_vm8, %v207_v51 }
 0x388   :  { %550 = vadd.xlane.f32.xlu1 %v549_v59 }
 0x38c   :  { %v316_v54 = vpop.xlane.xlu2 %315 }
 0x38d   :  { %v232_v56 = vpop.permute.xlu1 %231 }
 0x38e   :  { %v237_v57 = vsel %vm214_vm9, %v232_v56, 0 }
 0x38f   :  { %246 = vmatpush.bf16.msrb.mxu3 %v237_v57 }
 0x393   :  { %341 = vmatpush.bf16.msra.mxu3 %v332_v58 }
 0x394   :  { %v202_v55 = vpop.xlane.xlu2 %201 }
 0x395   :  { %1092 = vrcp.f32 %v202_v55 }
 0x39b   :  { %v1093_v60 = vpop.eup %1092 }
 0x39c   :  { %v206_v61 = vmul.f32 %v1093_v60, %v1079_v23  ;;  %v432_v62 = vpop.xlane.xlu0 %431  ;;  %v348_v63 = vpop.permute.xlu2 %347 }
 0x39d   :  { %1094 = vrcp.f32 %v432_v62  ;;  %v353_v3 = vsel %vm214_vm9, %v348_v63, 0 }
 0x39e   :  { %v208_v1 = vpack.c.bf16 %v206_v61, %v206_v61  ;;  %1096 = vrcp.f32 %v316_v54 }
 0x3a0   :  { %953 = vmatmul.msk.bf16.vlgmr.msrb.gmra.mxu3 %vm135_vm8, %v208_v1 }
 0x3a1   :  { %362 = vmatpush.bf16.msrb.mxu3 %v353_v3 }
 0x3a3   :  { %v1095_v4 = vpop.eup %1094 }
 0x3a4   :  { %v438_v5 = vmul.f32 %v1095_v4, %v1315_v27  ;;  %v1097_v7 = vpop.eup %1096 }
 0x3a5   :  { %v322_v8 = vmul.f32 %v1097_v7, %v1308_v20 }
 0x3a6   :  { %v440_v6 = vpack.c.bf16 %v438_v5, %v438_v5 }
 0x3a7   :  { %v324_v9 = vpack.c.bf16 %v322_v8, %v322_v8 }
 0x3a8   :  { %960 = vmatmul.msk.bf16.vlgmr.msrb.gmra.mxu2 %vm135_vm8, %v440_v6 }
 0x3ac   :  { %v548_v15 = vpop.xlane.xlu0 %547 }
 0x3b0   :  { %956 = vmatmul.msk.bf16.vlgmr.msra.gmra.mxu3 %vm135_vm8, %v324_v9 }
 0x3b8   :  { %v319_v11 = vpop.xlane.xlu1 %318 }
 0x3b9   :  { %1098 = vrcp.f32 %v319_v11 }
 0x3ba   :  { %1100 = vrcp.f32 %v548_v15 }
 0x3bf   :  { %v1099_v12 = vpop.eup %1098  ;;  %v580_v16 = vpop.permute.xlu0 %579 }
 0x3c0   :  { %v323_v13 = vmul.f32 %v1099_v12, %v1085_v40  ;;  %v585_v19 = vsel %vm214_vm9, %v580_v16, 0  ;;  %v1101_v21 = vpop.eup %1100 }
 0x3c1   :  { %v554_v23 = vmul.f32 %v1101_v21, %v1320_v34 }
 0x3c2   :  { %v325_v14 = vpack.c.bf16 %v323_v13, %v323_v13 }
 0x3c3   :  { %v556_v28 = vpack.c.bf16 %v554_v23, %v554_v23  ;;  %v1023_v23 = vld [vmem:[%s1451_s3 + $0x8] sm:$0xff] }
 0x3c4   :  { %957 = vmatmul.msk.bf16.vlgmr.msrb.gmra.mxu3 %vm135_vm8, %v325_v14  ;;  %744 = vmatpush.bf16.msra.mxu1 %v1023_v23 }
 0x3d0   :  { %v464_v17 = vpop.permute.xlu1 %463 }
 0x3d1   :  { %v469_v18 = vsel %vm214_vm9, %v464_v17, 0 }
 0x3d2   :  { %478 = vmatpush.bf16.msra.mxu3 %v469_v18 }
 0x3d5   :  { %v435_v20 = vpop.xlane.xlu2 %434 }
 0x3d6   :  { %594 = vmatpush.bf16.msrb.mxu3 %v585_v19  ;;  %1102 = vrcp.f32 %v435_v20 }
 0x3dc   :  { %v1103_v22 = vpop.eup %1102 }
 0x3dd   :  { %v439_v24 = vmul.f32 %v1103_v22, %v1330_v44  ;;  %v559_v25 = vpop.permute.xlu2 %558 }
 0x3de   :  { %v564_v26 = vsel %vm214_vm9, %v559_v25, 0 }
 0x3df   :  { %v441_v27 = vpack.c.bf16 %v439_v24, %v439_v24  ;;  %573 = vmatpush.bf16.msra.mxu2 %v564_v26  ;;  %v1022_v26 = vld [vmem:[%s1451_s3] sm:$0xff] }
 0x3e0   :  { %745 = vmatpush.bf16.msra.mxu1 %v1022_v26 }
 0x3e1   :  { %961 = vmatmul.msk.bf16.vlgmr.msra.gmra.mxu3 %vm135_vm8, %v441_v27 }
 0x3e2   :  { %964 = vmatmul.msk.bf16.vlgmr.msra.gmra.mxu2 %vm135_vm8, %v556_v28 }
 0x3fb   :  { %v551_v29 = vpop.xlane.xlu1 %550 }
 0x3fc   :  { %1104 = vrcp.f32 %v551_v29 }
 0x402   :  { %v1105_v30 = vpop.eup %1104 }
 0x403   :  { %v555_v31 = vmul.f32 %v1105_v30, %v1091_v52  ;;  %v1021_v52 = vld [vmem:[%s1450_s2 + $0x8] sm:$0xff]  ;;  %s1156_s2 = smov 128  }
 0x404   :  { %v227_v32 = vpop.f32.mrf.mxu3  ;;  %658 = vmatpush.bf16.msra.mxu0 %v1021_v52 }
 0x405   :  { %v557_v33 = vpack.c.bf16 %v555_v31, %v555_v31 }
 0x407   :  { %965 = vmatmul.msk.bf16.vlgmr.msrb.gmra.mxu3 %vm135_vm8, %v557_v33 }
 0x408   :  { %659 = vmatpush.bf16.msra.mxu0 %v1020_v53  ;;  %v1031_v53 = vld [vmem:[%s1452_s4 + $0x38] sm:$0xff] }
 0x409   :  { %905 = vmatpush.bf16.msrb.mxu2 %v1031_v53 }
 0x40c   :  { %v229_v34 = vpop.f32.mrf.mxu3 }
 0x423   :  { %v248_v35 = vpop.f32.mrf.mxu3 }
 0x42b   :  { %v250_v36 = vpop.f32.mrf.mxu3  ;;  %v459_v37 = vpop.f32.mrf.mxu2 }
 0x433   :  { %v343_v39 = vpop.f32.mrf.mxu3  ;;  %v461_v40 = vpop.f32.mrf.mxu2 }
 0x43b   :  { %v345_v41 = vpop.f32.mrf.mxu3 }
 0x447   :  { %v364_v38 = vpop.f32.mrf.mxu3 }
 0x448   :  { %v1049_v42 = vpack.i.bf16 %v364_v38, %v343_v39 }
 0x44a   :  { %1050 = vrot.lane.b32.xlu2 %v1049_v42, %s1152_s18 }
 0x44f   :  { %v366_v43 = vpop.f32.mrf.mxu3 }
 0x464   :  { %v480_v44 = vpop.f32.mrf.mxu3 }
 0x465   :  { %v1054_v45 = vpack.i.bf16 %v480_v44, %v459_v37  ;;  %v575_v46 = vpop.f32.mrf.mxu2 }
 0x467   :  { %1055 = vrot.lane.b32.xlu2 %v1054_v45, %s1153_s19 }
 0x46c   :  { %v482_v47 = vpop.f32.mrf.mxu3 }
 0x46d   :  { %v577_v48 = vpop.f32.mrf.mxu2 }
 0x48a   :  { %v596_v50 = vpop.f32.mrf.mxu3 }
 0x48b   :  { %v1059_v49 = vpack.i.bf16 %v596_v50, %v575_v46  ;;  %v1067_v46 = vld [vmem:[%s1453_s5 + $0x3] ss:$0 sm:$0xff] }
 0x48d   :  { %1060 = vrot.lane.b32.xlu1 %v1059_v49, %s1154_s20 }
 0x492   :  { %v598_v51 = vpop.f32.mrf.mxu3 }
 0x4a4   :  { %v1051_v59 = vpop.permute.xlu2 %1050 }
 0x4a5   :  { %v1053_v56 = vunpack.i.h.bf16 %v1051_v59  ;;  %v1052_v57 = vunpack.i.l.bf16 %v1051_v59 }
 0x4a7   :  { %v625_v61 = vsel %vm135_vm8, %v248_v35, %v1053_v56  ;;  %v624_v62 = vsel %vm135_vm8, %v227_v32, %v1052_v57  ;;  %v1030_v57 = vld [vmem:[%s1452_s4 + $0x30] sm:$0xff] }
 0x4a8   :  { %906 = vmatpush.bf16.msrb.mxu2 %v1030_v57 }
 0x4c1   :  { %v1056_v54 = vpop.permute.xlu2 %1055 }
 0x4c2   :  { %v1058_v58 = vunpack.i.h.bf16 %v1056_v54  ;;  %v1057_v55 = vunpack.i.l.bf16 %v1056_v54 }
 0x4c4   :  { %v627_v3 = vsel %vm626_vm11, %v624_v62, %v1057_v55  ;;  %v628_v4 = vsel %vm626_vm11, %v625_v61, %v1058_v58  ;;  %v1029_v61 = vld [vmem:[%s1452_s4 + $0x28] sm:$0xff] }
 0x4c5   :  { %907 = vmatpush.bf16.msrb.mxu2 %v1029_v61 }
 0x4ff   :  { %v1061_v60 = vpop.permute.xlu1 %1060 }
 0x500   :  { %v1063_v63 = vunpack.i.h.bf16 %v1061_v60  ;;  %v1062_v1 = vunpack.i.l.bf16 %v1061_v60 }
 0x502   :  { %v630_v5 = vsel %vm629_vm12, %v627_v3, %v1062_v1  ;;  %v631_v6 = vsel %vm629_vm12, %v628_v4, %v1063_v63 }
 0x503   :  { %v632_v7 = vpack.c.bf16 %v631_v6, %v630_v5  ;;  %v1028_v5 = vld [vmem:[%s1452_s4 + $0x20] sm:$0xff] }
 0x504   :  { %908 = vmatpush.bf16.msrb.mxu2 %v1028_v5 }
 0x505   :  { %974 = vmatmul.msk.bf16.vlgmr.msra.gmra.mxu0 %vm31_vm0, %v632_v7 }
 0x582   :  { %v661_v8 = vpop.f32.mrf.mxu0 }
 0x583   :  { %v1368_v9 = vadd.f32 %v661_v8, %v1195_v0 }
 0x585   :  { %v668_v11 = vsel %vm31_vm0, %v1368_v9, 0.0 }
 0x586   :  { %669 = vadd.xlane.f32.xlu2 %v668_v11 }
 0x58a   :  { %v663_v12 = vpop.f32.mrf.mxu0 }
 0x58b   :  { %v1373_v13 = vadd.f32 %v663_v12, %v1202_v2 }
 0x58d   :  { %v671_v14 = vsel %vm31_vm0, %v1373_v13, 0.0 }
 0x58e   :  { %672 = vadd.xlane.f32.xlu0 %v671_v14  ;;  %v1027_v14 = vld [vmem:[%s1452_s4 + $0x18] sm:$0xff] }
 0x58f   :  { %909 = vmatpush.bf16.msrb.mxu2 %v1027_v14 }
 0x5f9   :  { %v670_v15 = vpop.xlane.xlu2 %669 }
 0x5fa   :  { %v674_v16 = vmul.f32 %v670_v15, %v1206_v10 }
 0x5fc   :  { %v676_v17 = vsub.f32 %v1368_v9, %v674_v16 }
 0x5fe   :  { %v678_v18 = vmul.f32 %v676_v17, %v676_v17 }
 0x600   :  { %v680_v0 = vsel %vm31_vm0, %v678_v18, 0.0 }
 0x601   :  { %681 = vadd.xlane.f32.xlu1 %v680_v0  ;;  %v673_v19 = vpop.xlane.xlu0 %672 }
 0x602   :  { %v675_v20 = vmul.f32 %v673_v19, %v1206_v10 }
 0x604   :  { %v677_v21 = vsub.f32 %v1373_v13, %v675_v20 }
 0x606   :  { %v679_v2 = vmul.f32 %v677_v21, %v677_v21 }
 0x608   :  { %v683_v22 = vsel %vm31_vm0, %v679_v2, 0.0 }
 0x609   :  { %684 = vadd.xlane.f32.xlu2 %v683_v22 }
 0x674   :  { %v682_v24 = vpop.xlane.xlu1 %681 }
 0x675   :  { %v686_v25 = vmul.f32 %v682_v24, %v1206_v10 }
 0x677   :  { %v688_v27 = vadd.f32 1e-05, %v686_v25 }
 0x679   :  { %1106 = vrsqrt.f32 %v688_v27  ;;  %vm696_vm14 = vweird.f32 %v688_v27 }
 0x67c   :  { %v685_v28 = vpop.xlane.xlu2 %684 }
 0x67d   :  { %v687_v29 = vmul.f32 %v685_v28, %v1206_v10  ;;  %v1066_v10 = vld [vmem:[%s1453_s5 + $0x2] ss:$0 sm:$0xff]  ;;  %v1025_v28 = vld [vmem:[%s1452_s4 + $0x8] sm:$0xff] }
 0x67f   :  { %v1107_v30 = vpop.eup %1106  ;;  %v689_v31 = vadd.f32 1e-05, %v687_v29 }
 0x680   :  { %v691_v32 = vmul.f32 %v1107_v30, %v688_v27  ;;  %vm697_vm13 = vweird.f32 %v1107_v30 }
 0x681   :  { %1108 = vrsqrt.f32 %v689_v31  ;;  %vm698_vm15 = vmor %vm696_vm14, %vm697_vm13  ;;  %vm706_vm2 = vweird.f32 %v689_v31 }
 0x682   :  { %v692_v33 = vmul.f32 %v1107_v30, %v691_v32 }
 0x684   :  { %v693_v34 = vmul.f32 0.5, %v692_v33 }
 0x686   :  { %v694_v35 = vsub.f32 1.5, %v693_v34  ;;  %v1024_v34 = vld [vmem:[%s1452_s4] sm:$0xff] }
 0x687   :  { %v1109_v36 = vpop.eup %1108 }
 0x688   :  { %v695_v37 = vmul.f32 %v1107_v30, %v694_v35  ;;  %v701_v39 = vmul.f32 %v1109_v36, %v689_v31  ;;  %vm707_vm1 = vweird.f32 %v1109_v36 }
 0x689   :  { %vm708_vm3 = vmor %vm706_vm2, %vm707_vm1 }
 0x68a   :  { %v702_v40 = vmul.f32 %v1109_v36, %v701_v39  ;;  %v699_v41 = vsel %vm698_vm15, %v1107_v30, %v695_v37 }
 0x68b   :  { %v710_v43 = vmul.f32 %v699_v41, %v676_v17 }
 0x68c   :  { %v703_v38 = vmul.f32 0.5, %v702_v40 }
 0x68d   :  { %v713_v47 = vmul.f32 %v1066_v10, %v710_v43 }
 0x68e   :  { %v704_v42 = vsub.f32 1.5, %v703_v38 }
 0x68f   :  { %v716_v49 = vadd.f32 %v1067_v46, %v713_v47 }
 0x690   :  { %v705_v44 = vmul.f32 %v1109_v36, %v704_v42 }
 0x692   :  { %v709_v45 = vsel %vm708_vm3, %v1109_v36, %v705_v44 }
 0x693   :  { %v711_v48 = vmul.f32 %v709_v45, %v677_v21  ;;  %v1026_v21 = vld [vmem:[%s1452_s4 + $0x10] sm:$0xff]  ;;  %s1155_s4 = smov [#allocation2]  }
 0x694   :  { %910 = vmatpush.bf16.msrb.mxu2 %v1026_v21  ;;  %s927_s21 = sshll.u32 %s1155_s4, 4  ;;  %s928_s21 = int_to_ptr.vmem [resolvable:$true] %s927_s21 }
 0x695   :  { %v714_v50 = vmul.f32 %v1066_v10, %v711_v48 }
 0x697   :  { %v717_v51 = vadd.f32 %v1067_v46, %v714_v50 }
 0x698   :  { %911 = vmatpush.bf16.msrb.mxu2 %v1025_v28 }
 0x699   :  { %v718_v52 = vpack.c.bf16 %v717_v51, %v716_v49 }
 0x69b   :  { %983 = vmatmul.msk.bf16.vlgmr.msra.gmra.mxu1 %vm31_vm0, %v718_v52 }
 0x69c   :  { %912 = vmatpush.bf16.msrb.mxu2 %v1024_v34 }
 0x718   :  { %v1401_v59 = vpop.f32.mrf.mxu1 }
 0x719   :  { %v1404_v54 = vmul.f32 0.70710677, %v1401_v59 }
 0x71b   :  { %v756_v56 = vmul.f32 %v1404_v54, %v1404_v54 }
 0x71d   :  { %v757_v58 = vmin.f32 %v756_v56, 16.0 }
 0x71f   :  { %v758_v55 = vmul.f32 2.1237322e-06, %v757_v58  ;;  %v769_v60 = vmul.f32 3.8918573e-05, %v757_v58 }
 0x720   :  { %v1414_v62 = vpop.f32.mrf.mxu1 }
 0x721   :  { %v759_v63 = vadd.f32 0.00028619796, %v758_v55  ;;  %v770_v1 = vadd.f32 0.001143296, %v769_v60  ;;  %v1417_v3 = vmul.f32 0.70710677, %v1414_v62 }
 0x723   :  { %v771_v4 = vmul.f32 %v770_v1, %v757_v58  ;;  %v796_v6 = vmul.f32 %v1417_v3, %v1417_v3  ;;  %v760_v7 = vmul.f32 %v759_v63, %v757_v58 }
 0x725   :  { %v772_v8 = vadd.f32 0.014752088, %v771_v4  ;;  %v797_v11 = vmin.f32 %v796_v6, 16.0  ;;  %v761_v17 = vadd.f32 0.0036580483, %v760_v7 }
 0x727   :  { %v773_v12 = vmul.f32 %v772_v8, %v757_v58  ;;  %v798_v15 = vmul.f32 2.1237322e-06, %v797_v11  ;;  %v809_v16 = vmul.f32 3.8918573e-05, %v797_v11  ;;  %v762_v23 = vmul.f32 %v761_v17, %v757_v58 }
 0x729   :  { %v774_v18 = vadd.f32 0.112945676, %v773_v12  ;;  %v799_v0 = vadd.f32 0.00028619796, %v798_v15  ;;  %v810_v19 = vadd.f32 0.001143296, %v809_v16 }
 0x72a   :  { %v763_v30 = vadd.f32 0.05243302, %v762_v23 }
 0x72b   :  { %v775_v20 = vmul.f32 %v774_v18, %v757_v58  ;;  %v800_v2 = vmul.f32 %v799_v0, %v797_v11  ;;  %v811_v22 = vmul.f32 %v810_v19, %v797_v11  ;;  %v752_v18 = vmul.f32 0.5, %v1401_v59 }
 0x72c   :  { %v764_v36 = vmul.f32 %v763_v30, %v757_v58  ;;  %v753_v0 = vmul.f32 0.5, %v1414_v62 }
 0x72d   :  { %v776_v24 = vadd.f32 0.4994258, %v775_v20  ;;  %v801_v25 = vadd.f32 0.0036580483, %v800_v2  ;;  %v812_v26 = vadd.f32 0.014752088, %v811_v22 }
 0x72e   :  { %v765_v38 = vadd.f32 0.18741608, %v764_v36 }
 0x72f   :  { %v777_v27 = vmul.f32 %v776_v24, %v757_v58  ;;  %v813_v29 = vmul.f32 %v812_v26, %v797_v11  ;;  %v802_v32 = vmul.f32 %v801_v25, %v797_v11 }
 0x730   :  { %v766_v45 = vmul.f32 %v765_v38, %v757_v58 }
 0x731   :  { %v778_v31 = vadd.f32 1.0, %v777_v27  ;;  %v814_v33 = vadd.f32 0.112945676, %v813_v29  ;;  %v803_v37 = vadd.f32 0.05243302, %v802_v32 }
 0x732   :  { %v767_v51 = vadd.f32 1.1283791, %v766_v45 }
 0x733   :  { %1110 = vrcp.f32 %v778_v31  ;;  %v815_v35 = vmul.f32 %v814_v33, %v797_v11  ;;  %v804_v10 = vmul.f32 %v803_v37, %v797_v11  ;;  %v790_v47 = vand.u32 2147483648, %v778_v31 }
 0x734   :  { %v788_v50 = vand.u32 2147483647, %v778_v31  ;;  %vm784_vm5 = vweird.f32 %v778_v31  ;;  %v768_v61 = vmul.f32 %v767_v51, %v1404_v54 }
 0x735   :  { %v816_v39 = vadd.f32 0.4994258, %v815_v35  ;;  %v805_v48 = vadd.f32 0.18741608, %v804_v10  ;;  %v791_v56 = vor.u32 1.1754944e-38, %v790_v47 }
 0x736   :  { %vm789_vm7 = vcmp.eq.f32.partialorder %v788_v50, 8.507059e+37 }
 0x737   :  { %v817_v40 = vmul.f32 %v816_v39, %v797_v11  ;;  %v806_v57 = vmul.f32 %v805_v48, %v797_v11 }
 0x739   :  { %v1111_v41 = vpop.eup %1110  ;;  %v818_v43 = vadd.f32 1.0, %v817_v40  ;;  %v807_v58 = vadd.f32 1.1283791, %v806_v57 }
 0x73a   :  { %v780_v42 = vmul.f32 %v1111_v41, %v778_v31  ;;  %vm785_vm4 = vweird.f32 %v1111_v41 }
 0x73b   :  { %1112 = vrcp.f32 %v818_v43  ;;  %vm786_vm6 = vmor %vm784_vm5, %vm785_vm4  ;;  %v830_v1 = vand.u32 2147483648, %v818_v43  ;;  %v828_v6 = vand.u32 2147483647, %v818_v43  ;;  %vm824_vm9 = vweird.f32 %v818_v43 }
 0x73c   :  { %v781_v44 = vsub.f32 1.0, %v780_v42  ;;  %v808_v14 = vmul.f32 %v807_v58, %v1417_v3 }
 0x73d   :  { %v831_v8 = vor.u32 1.1754944e-38, %v830_v1  ;;  %vm829_vm11 = vcmp.eq.f32.partialorder %v828_v6, 8.507059e+37 }
 0x73e   :  { %v782_v46 = vmul.f32 %v1111_v41, %v781_v44 }
 0x740   :  { %v783_v49 = vadd.f32 %v1111_v41, %v782_v46 }
 0x741   :  { %v1113_v52 = vpop.eup %1112 }
 0x742   :  { %v787_v53 = vsel %vm786_vm6, %v1111_v41, %v783_v49  ;;  %v820_v55 = vmul.f32 %v1113_v52, %v818_v43  ;;  %vm825_vm8 = vweird.f32 %v1113_v52 }
 0x743   :  { %v792_v60 = vsel %vm789_vm7, %v791_v56, %v787_v53  ;;  %vm826_vm10 = vmor %vm824_vm9, %vm825_vm8 }
 0x744   :  { %v821_v63 = vsub.f32 1.0, %v820_v55  ;;  %v793_v4 = vmul.f32 %v792_v60, %v768_v61 }
 0x746   :  { %v822_v5 = vmul.f32 %v1113_v52, %v821_v63  ;;  %v984_v12 = vclamps-f32 %v793_v4, 1.0 }
 0x748   :  { %v823_v7 = vadd.f32 %v1113_v52, %v822_v5  ;;  %v836_v17 = vadd.f32 1.0, %v984_v12 }
 0x74a   :  { %v827_v11 = vsel %vm826_vm10, %v1113_v52, %v823_v7  ;;  %v838_v20 = vmul.f32 %v836_v17, %v752_v18 }
 0x74b   :  { %v832_v15 = vsel %vm829_vm11, %v831_v8, %v827_v11 }
 0x74c   :  { %v833_v16 = vmul.f32 %v832_v15, %v808_v14 }
 0x74e   :  { %v985_v54 = vclamps-f32 %v833_v16, 1.0 }
 0x750   :  { %v837_v19 = vadd.f32 1.0, %v985_v54 }
 0x752   :  { %v839_v21 = vmul.f32 %v837_v19, %v753_v0 }
 0x754   :  { %v840_v2 = vpack.c.bf16 %v839_v21, %v838_v20 }
 0x756   :  { %913 = vmatmul.bf16.vlgmr.msrb.gmra.mxu2 %v840_v2 }
 0x7d9   :  { %v914_v22 = vpop.f32.mrf.mxu2 }
 0x7da   :  { %v919_v23 = vadd.f32 %v914_v22, %v1368_v9 }
 0x7dc   :  { %921 = vst.msk [vmem:[#allocation2] sm:$0xff] %vm31_vm0, %v919_v23 }
 0x7e1   :  { %v916_v3 = vpop.f32.mrf.mxu2 }
 0x7e2   :  { %v920_v59 = vadd.f32 %v916_v3, %v1373_v13 }
 0x7e4   :  { %922 = vst.msk [vmem:[#allocation2 + $0x8] sm:$0xff] %vm31_vm0, %v920_v59 }
 0x7e5   :  { %935 = dma.vmem_to_hbm [thread:$0]  %s928_s21, 256, %s930_s24, [#allocation3], %s1156_s2, %s1156_s2, %s1152_s18  }
 0x7e6   :  { %1138 = dma.done.wait [#allocation3], 256  }
 0x7e7   :  { %1139 = vsyncadd [#allocation3], 4294967040 }
 0x7e8   :  { %940 = vsyncpa [#allocation3], 1 }

</bundles_post_ra>
